<compile_context>
chip_gen: v7x
topology: tpu7x:2x2x1
jax: 0.10.0
libtpu: 0.0.40
codegen_flags: <defaults>
</compile_context>

<pallas_src>
import functools

import jax
import jax.numpy as jnp
from jax import lax
from jax.experimental import pallas as pl
from jax.experimental.pallas import tpu as pltpu


def _mlm_head_kernel(h_ref, w_ref, b_ref, lab_ref, loss_ref, hit_ref,
                     m_sc, l_sc, amax_idx_sc, lab_logit_sc):
    """Grid = (n_row_tiles, n_item_tiles).

    Axis 0 tiles the masked rows ("parallel", shards across TensorCores);
    axis 1 is the reduction over the item/vocab axis ("arbitrary").

    h_ref:   (TM, E)              bf16 masked-position hidden states (resident over j)
    w_ref:   (TN, E)              bf16 decoder-weight tile (rows = items)
    b_ref:   (n_item_tiles, TN)   f32 full bias, resident across the whole grid
    lab_ref: (TM, 1)              int32 labels
    loss_ref:(TM, 1)              f32 per-row cross entropy (written at last item tile)
    hit_ref: (TM, 1)              int32 per-row correctness (written at last item tile)
    """
    j = pl.program_id(1)
    tn = w_ref.shape[0]

    @pl.when(j == 0)
    def _():
        m_sc[...] = jnp.full_like(m_sc, -jnp.inf)
        l_sc[...] = jnp.zeros_like(l_sc)
        amax_idx_sc[...] = jnp.zeros_like(amax_idx_sc)
        lab_logit_sc[...] = jnp.zeros_like(lab_logit_sc)

    # logits = h @ W_tile^T + b_tile. Contract the last dim of both operands so
    # Mosaic feeds the MXU natively (no explicit VMEM transpose of the weight
    # tile). bf16 inputs, f32 accumulation.
    logits = lax.dot_general(
        h_ref[...], w_ref[...],
        dimension_numbers=(((1,), (1,)), ((), ())),
        preferred_element_type=jnp.float32)
    logits = logits + b_ref[pl.ds(j, 1), :]              # (TM, TN) + (1, TN)

    # Global item (vocab) indices of the columns in this tile.
    col = lax.broadcasted_iota(jnp.int32, logits.shape, 1) + j * tn
    lab = lab_ref[...]                                   # (TM, 1) int32

    # Logit at the label position (exactly one tile contributes per row).
    lab_logit_sc[...] += jnp.sum(
        jnp.where(col == lab, logits, 0.0), axis=-1, keepdims=True)

    local_max = jnp.max(logits, axis=-1, keepdims=True)

    # Running argmax, first occurrence (matches torch.argmax):
    #   within tile -> min index among maxima; across tiles -> strict '>' so
    #   earlier tiles win ties. m_sc (the running max) replaces the old
    #   dedicated amax_val scratch.
    big = jnp.iinfo(jnp.int32).max
    local_arg = jnp.min(jnp.where(logits == local_max, col, big),
                        axis=-1, keepdims=True)
    better = local_max > m_sc[...]
    amax_idx_sc[...] = jnp.where(better, local_arg, amax_idx_sc[...])

    # Online logsumexp accumulation.
    m_new = jnp.maximum(m_sc[...], local_max)
    l_sc[...] = (l_sc[...] * jnp.exp(m_sc[...] - m_new)
                 + jnp.sum(jnp.exp(logits - m_new), axis=-1, keepdims=True))
    m_sc[...] = m_new

    @pl.when(j == pl.num_programs(1) - 1)
    def _():
        # per-row cross entropy: logsumexp(logits) - logits[label]
        loss_ref[...] = m_sc[...] + jnp.log(l_sc[...]) - lab_logit_sc[...]
        hit_ref[...] = (amax_idx_sc[...] == lab_ref[...]).astype(jnp.int32)


@functools.partial(jax.jit, static_argnames=("tm", "tn"))
def mlm_head_loss_and_hits(mask_hidden, decoder_weight, bias, mask_label,
                           *, tm=256, tn=512):
    """mask_hidden: (n_mask, E); decoder_weight: (n_items, E); bias: (n_items,);
    mask_label: (n_mask,) int32.  Returns (mlm_loss f32 scalar, mlm_hit i32 scalar).

    Inputs to the matmul are cast to bf16 (no-op if already bf16) with f32
    accumulation on the MXU.
    """
    n_mask, emb_dim = mask_hidden.shape
    n_items = decoder_weight.shape[0]

    tm = min(tm, n_mask)
    tn = min(tn, n_items)
    assert n_mask % tm == 0 and (tm % 8 == 0 or tm == n_mask), \
        "row tile must divide n_mask and be a sublane multiple"
    assert n_items % tn == 0 and tn % 128 == 0, \
        "item tile must divide n_items and be a lane multiple"
    n_row_tiles = n_mask // tm
    n_item_tiles = n_items // tn

    # bf16 compute inputs (cast is a no-op when params are already bf16).
    h = mask_hidden.astype(jnp.bfloat16)
    w = decoder_weight.astype(jnp.bfloat16)
    # Bias stays f32, reshaped so the per-tile slice is a sublane index
    # (resident in VMEM for the whole grid -> single DMA).
    bias2d = bias.astype(jnp.float32).reshape(n_item_tiles, tn)
    lab2d = mask_label.reshape(n_mask, 1).astype(jnp.int32)

    loss_rows, hit_rows = pl.pallas_call(
        _mlm_head_kernel,
        out_shape=(
            jax.ShapeDtypeStruct((n_mask, 1), jnp.float32),
            jax.ShapeDtypeStruct((n_mask, 1), jnp.int32),
        ),
        grid_spec=pltpu.PrefetchScalarGridSpec(
            num_scalar_prefetch=0,
            grid=(n_row_tiles, n_item_tiles),
            in_specs=[
                pl.BlockSpec((tm, emb_dim), lambda i, j: (i, 0)),       # hidden
                pl.BlockSpec((tn, emb_dim), lambda i, j: (j, 0)),       # weight tile
                pl.BlockSpec((n_item_tiles, tn), lambda i, j: (0, 0)),  # bias (resident)
                pl.BlockSpec((tm, 1), lambda i, j: (i, 0)),             # labels
            ],
            out_specs=[
                pl.BlockSpec((tm, 1), lambda i, j: (i, 0)),
                pl.BlockSpec((tm, 1), lambda i, j: (i, 0)),
            ],
            scratch_shapes=[
                pltpu.VMEM((tm, 1), jnp.float32),  # running max (also argmax value)
                pltpu.VMEM((tm, 1), jnp.float32),  # running sum-exp
                pltpu.VMEM((tm, 1), jnp.int32),    # running argmax index
                pltpu.VMEM((tm, 1), jnp.float32),  # label logit
            ],
        ),
        compiler_params=pltpu.CompilerParams(
            dimension_semantics=("parallel", "arbitrary"),
            vmem_limit_bytes=48 * 1024 * 1024),
    )(h, w, bias2d, lab2d)

    mlm_loss = jnp.mean(loss_rows)          # F.cross_entropy default: mean
    mlm_hit = jnp.sum(hit_rows)             # (preds == labels).sum()
    return mlm_loss, mlm_hit


def pretrain_model_forward(item_seq, mask_i, mask_j, params, compute_loss=True):
    """Mirrors PretrainModel.forward.

    item_seq: (bs, seq_len) int32 item ids
    mask_i, mask_j: 1-D index arrays of masked positions (the two lists in
                    `mask_index`)
    params: dict with 'item_embedding' (n_items, E), 'mlm_bias' (n_items,),
            'mask_token' (1, E)
    """
    emb_w = params["item_embedding"]                         # keep bf16 end-to-end
    # item_embs = embedding(item_seq)
    item_embs = jnp.take(emb_w, item_seq, axis=0)            # (bs, seq, E)
    # item_embs[mask_index] = mask_token
    item_embs = item_embs.at[mask_i, mask_j].set(
        params["mask_token"][0].astype(item_embs.dtype))
    # TODO(synk): base_model encoder is identity here (architecture unknown).
    hidden_states = item_embs
    # hidden_states[mask_index]
    mask_hidden = hidden_states[mask_i, mask_j]              # (n_mask, E)
    mask_label = item_seq[mask_i, mask_j]                    # (n_mask,)

    mlm_loss, mlm_hit = mlm_head_loss_and_hits(
        mask_hidden, emb_w, params["mlm_bias"], mask_label)
    if compute_loss:
        return mlm_loss, mlm_hit
    return mlm_hit


def _reference(item_seq, mask_i, mask_j, params):
    """Plain-JAX reference (same bf16-in / f32-accumulate numerics)."""
    emb_w = params["item_embedding"].astype(jnp.bfloat16)
    item_embs = jnp.take(emb_w, item_seq, axis=0)
    item_embs = item_embs.at[mask_i, mask_j].set(
        params["mask_token"][0].astype(jnp.bfloat16))
    h = item_embs[mask_i, mask_j]
    logits = lax.dot_general(h, emb_w,
                             dimension_numbers=(((1,), (1,)), ((), ())),
                             preferred_element_type=jnp.float32)
    logits = logits + params["mlm_bias"].astype(jnp.float32)
    labels = item_seq[mask_i, mask_j]
    preds = jnp.argmax(logits, axis=-1)
    hit = jnp.sum(preds == labels)
    lse = jax.scipy.special.logsumexp(logits, axis=-1)
    loss = jnp.mean(lse - jnp.take_along_axis(logits, labels[:, None],
                                              axis=-1)[:, 0])
    return loss, hit


if __name__ == "__main__":
    key = jax.random.PRNGKey(0)
    k_emb, k_mask_tok, k_seq = jax.random.split(key, 3)

    # Small shapes consistent with the module; n_items=1024 exercises two
    # 512-wide item tiles of the reduction loop.
    bs, seq_len, emb_dim, n_items = 2, 8, 32, 1024

    params = {
        # nn.Embedding weight, init normal(0, 0.02) per _init_weights (stored bf16)
        "item_embedding": (0.02 * jax.random.normal(
            k_emb, (n_items, emb_dim), dtype=jnp.float32)).astype(jnp.bfloat16),
        # MLMHead bias: zeros
        "mlm_bias": jnp.zeros((n_items,), dtype=jnp.float32),
        # mask_token ~ normal(0, 0.02)
        "mask_token": (0.02 * jax.random.normal(
            k_mask_tok, (1, emb_dim), dtype=jnp.float32)).astype(jnp.bfloat16),
    }

    item_seq = jax.random.randint(k_seq, (bs, seq_len), 0, n_items,
                                  dtype=jnp.int32)
    # mask_index: 4 masked positions per sequence -> 8 total (multiple of 8)
    mask_i = jnp.array([0, 0, 0, 0, 1, 1, 1, 1], dtype=jnp.int32)
    mask_j = jnp.array([1, 3, 5, 7, 0, 2, 4, 6], dtype=jnp.int32)

    mlm_loss, mlm_hit = pretrain_model_forward(item_seq, mask_i, mask_j, params)
    jax.block_until_ready((mlm_loss, mlm_hit))

    ref_loss, ref_hit = _reference(item_seq, mask_i, mask_j, params)
    assert jnp.allclose(mlm_loss, ref_loss, rtol=2e-3, atol=2e-3), (mlm_loss, ref_loss)
    assert int(mlm_hit) == int(ref_hit), (int(mlm_hit), int(ref_hit))

    print("KERNEL_OK")
</pallas_src>

<mosaic_0001>
module attributes {stable_mosaic.version = 11 : i64} {
  func.func @_mlm_head_kernel(%arg0: i32, %arg1: i32, %arg2: memref<8x32xbf16, #tpu.memory_space<vmem>>, %arg3: memref<512x32xbf16, #tpu.memory_space<vmem>>, %arg4: memref<2x512xf32, #tpu.memory_space<vmem>>, %arg5: memref<8x1xi32, #tpu.memory_space<vmem>>, %arg6: memref<8x1xf32, #tpu.memory_space<vmem>>, %arg7: memref<8x1xi32, #tpu.memory_space<vmem>>, %arg8: memref<8x1xf32, #tpu.memory_space<vmem>>, %arg9: memref<8x1xf32, #tpu.memory_space<vmem>>, %arg10: memref<8x1xi32, #tpu.memory_space<vmem>>, %arg11: memref<8x1xf32, #tpu.memory_space<vmem>>) attributes {dimension_semantics = [#tpu.dimension_semantics<parallel>, #tpu.dimension_semantics<arbitrary>], iteration_bounds = array<i64: 1, 2>, scalar_prefetch = 0 : i64, scratch_operands = 4 : i64, tpu.core_type = #tpu.core_type<tc>, window_params = [{transform_indices = @transform_0, window_bounds = array<i64: 8, 32>}, {transform_indices = @transform_1, window_bounds = array<i64: 512, 32>}, {pipeline_mode = #tpu.pipeline_mode<synchronous>, transform_indices = @transform_2, window_bounds = array<i64: 2, 512>}, {transform_indices = @transform_3, window_bounds = array<i64: 8, 1>}, {transform_indices = @transform_4, window_bounds = array<i64: 8, 1>}, {transform_indices = @transform_5, window_bounds = array<i64: 8, 1>}]} {
    %c0_i32 = arith.constant 0 : i32
    %0 = arith.cmpi eq, %arg1, %c0_i32 : i32
    %1 = arith.extui %0 : i1 to i32
    %c0_i32_0 = arith.constant 0 : i32
    %2 = arith.cmpi ne, %1, %c0_i32_0 : i32
    scf.if %2 {
      %cst_33 = arith.constant 0xFF800000 : f32
      %55 = vector.broadcast %cst_33 : f32 to vector<8x1xf32>
      %c0_34 = arith.constant 0 : index
      %c0_35 = arith.constant 0 : index
      %56 = vector.load %arg8[%c0_34, %c0_35] : memref<8x1xf32, #tpu.memory_space<vmem>>, vector<8x1xf32>
      tpu.vector_store %arg8[%c0_34, %c0_35], %55 {strides = array<i32>} : memref<8x1xf32, #tpu.memory_space<vmem>>, vector<8x1xf32>,
      %cst_36 = arith.constant 0.000000e+00 : f32
      %57 = vector.broadcast %cst_36 : f32 to vector<8x1xf32>
      %c0_37 = arith.constant 0 : index
      %c0_38 = arith.constant 0 : index
      %58 = vector.load %arg9[%c0_37, %c0_38] : memref<8x1xf32, #tpu.memory_space<vmem>>, vector<8x1xf32>
      tpu.vector_store %arg9[%c0_37, %c0_38], %57 {strides = array<i32>} : memref<8x1xf32, #tpu.memory_space<vmem>>, vector<8x1xf32>,
      %c0_i32_39 = arith.constant 0 : i32
      %59 = vector.broadcast %c0_i32_39 : i32 to vector<8x1xi32>
      %c0_40 = arith.constant 0 : index
      %c0_41 = arith.constant 0 : index
      %60 = vector.load %arg10[%c0_40, %c0_41] : memref<8x1xi32, #tpu.memory_space<vmem>>, vector<8x1xi32>
      tpu.vector_store %arg10[%c0_40, %c0_41], %59 {strides = array<i32>} : memref<8x1xi32, #tpu.memory_space<vmem>>, vector<8x1xi32>,
      %cst_42 = arith.constant 0.000000e+00 : f32
      %61 = vector.broadcast %cst_42 : f32 to vector<8x1xf32>
      %c0_43 = arith.constant 0 : index
      %c0_44 = arith.constant 0 : index
      %62 = vector.load %arg11[%c0_43, %c0_44] : memref<8x1xf32, #tpu.memory_space<vmem>>, vector<8x1xf32>
      tpu.vector_store %arg11[%c0_43, %c0_44], %61 {strides = array<i32>} : memref<8x1xf32, #tpu.memory_space<vmem>>, vector<8x1xf32>,
    } else {
    }
    %c0 = arith.constant 0 : index
    %c0_1 = arith.constant 0 : index
    %3 = vector.load %arg2[%c0, %c0_1] : memref<8x32xbf16, #tpu.memory_space<vmem>>, vector<8x32xbf16>
    %c0_2 = arith.constant 0 : index
    %c0_3 = arith.constant 0 : index
    %4 = vector.load %arg3[%c0_2, %c0_3] : memref<512x32xbf16, #tpu.memory_space<vmem>>, vector<512x32xbf16>
    %cst = arith.constant dense<0.000000e+00> : vector<8x512xf32>
    %5 = tpu.matmul %3, %4, %cst {dimension_numbers = #tpu.dot_dimension_numbers<[1], [1], [0], [0], [0, 0, 1, 0], [], []>} : vector<8x32xbf16>, vector<512x32xbf16>, vector<8x512xf32> -> vector<8x512xf32>
    %6 = arith.index_cast %arg1 : i32 to index
    %c0_4 = arith.constant 0 : index
    %7 = vector.load %arg4[%6, %c0_4] : memref<2x512xf32, #tpu.memory_space<vmem>>, vector<1x512xf32>
    %8 = vector.broadcast %7 : vector<1x512xf32> to vector<8x512xf32>
    %9 = arith.addf %5, %8 : vector<8x512xf32>
    %10 = tpu.iota {dimensions = array<i32: 1>} : vector<8x512xi32>
    %c512_i32 = arith.constant 512 : i32
    %11 = arith.muli %arg1, %c512_i32 : i32
    %12 = vector.broadcast %11 : i32 to vector<8x512xi32>
    %13 = arith.addi %10, %12 : vector<8x512xi32>
    %c0_5 = arith.constant 0 : index
    %c0_6 = arith.constant 0 : index
    %14 = vector.load %arg5[%c0_5, %c0_6] : memref<8x1xi32, #tpu.memory_space<vmem>>, vector<8x1xi32>
    %c0_7 = arith.constant 0 : index
    %c0_8 = arith.constant 0 : index
    %15 = vector.load %arg11[%c0_7, %c0_8] : memref<8x1xf32, #tpu.memory_space<vmem>>, vector<8x1xf32>
    %16 = vector.broadcast %14 : vector<8x1xi32> to vector<8x512xi32>
    %17 = arith.cmpi eq, %13, %16 : vector<8x512xi32>
    %cst_9 = arith.constant 0.000000e+00 : f32
    %18 = vector.broadcast %cst_9 : f32 to vector<8x512xf32>
    %19 = arith.select %17, %9, %18 : vector<8x512xi1>, vector<8x512xf32>
    %cst_10 = arith.constant dense<0.000000e+00> : vector<8xf32>
    %20 = vector.multi_reduction <add>, %19, %cst_10 [1] : vector<8x512xf32> to vector<8xf32>
    %21 = vector.shape_cast %20 : vector<8xf32> to vector<8x1xf32>
    %22 = arith.addf %15, %21 : vector<8x1xf32>
    %c0_11 = arith.constant 0 : index
    %c0_12 = arith.constant 0 : index
    %23 = vector.load %arg11[%c0_11, %c0_12] : memref<8x1xf32, #tpu.memory_space<vmem>>, vector<8x1xf32>
    tpu.vector_store %arg11[%c0_11, %c0_12], %22 {strides = array<i32>} : memref<8x1xf32, #tpu.memory_space<vmem>>, vector<8x1xf32>,
    %cst_13 = arith.constant dense<0xFF800000> : vector<8xf32>
    %24 = vector.multi_reduction <maximumf>, %9, %cst_13 [1] : vector<8x512xf32> to vector<8xf32>
    %25 = vector.shape_cast %24 : vector<8xf32> to vector<8x1xf32>
    %26 = vector.broadcast %25 : vector<8x1xf32> to vector<8x512xf32>
    %27 = arith.cmpf oeq, %9, %26 : vector<8x512xf32>
    %c2147483647_i32 = arith.constant 2147483647 : i32
    %28 = vector.broadcast %c2147483647_i32 : i32 to vector<8x512xi32>
    %29 = arith.select %27, %13, %28 : vector<8x512xi1>, vector<8x512xi32>
    %cst_14 = arith.constant dense<2147483647> : vector<8xi32>
    %30 = vector.multi_reduction <minsi>, %29, %cst_14 [1] : vector<8x512xi32> to vector<8xi32>
    %31 = vector.shape_cast %30 : vector<8xi32> to vector<8x1xi32>
    %c0_15 = arith.constant 0 : index
    %c0_16 = arith.constant 0 : index
    %32 = vector.load %arg8[%c0_15, %c0_16] : memref<8x1xf32, #tpu.memory_space<vmem>>, vector<8x1xf32>
    %33 = arith.cmpf ogt, %25, %32 : vector<8x1xf32>
    %c0_17 = arith.constant 0 : index
    %c0_18 = arith.constant 0 : index
    %34 = vector.load %arg10[%c0_17, %c0_18] : memref<8x1xi32, #tpu.memory_space<vmem>>, vector<8x1xi32>
    %35 = arith.select %33, %31, %34 : vector<8x1xi1>, vector<8x1xi32>
    %c0_19 = arith.constant 0 : index
    %c0_20 = arith.constant 0 : index
    %36 = vector.load %arg10[%c0_19, %c0_20] : memref<8x1xi32, #tpu.memory_space<vmem>>, vector<8x1xi32>
    tpu.vector_store %arg10[%c0_19, %c0_20], %35 {strides = array<i32>} : memref<8x1xi32, #tpu.memory_space<vmem>>, vector<8x1xi32>,
    %c0_21 = arith.constant 0 : index
    %c0_22 = arith.constant 0 : index
    %37 = vector.load %arg8[%c0_21, %c0_22] : memref<8x1xf32, #tpu.memory_space<vmem>>, vector<8x1xf32>
    %38 = arith.maximumf %37, %25 : vector<8x1xf32>
    %c0_23 = arith.constant 0 : index
    %c0_24 = arith.constant 0 : index
    %39 = vector.load %arg9[%c0_23, %c0_24] : memref<8x1xf32, #tpu.memory_space<vmem>>, vector<8x1xf32>
    %c0_25 = arith.constant 0 : index
    %c0_26 = arith.constant 0 : index
    %40 = vector.load %arg8[%c0_25, %c0_26] : memref<8x1xf32, #tpu.memory_space<vmem>>, vector<8x1xf32>
    %41 = arith.subf %40, %38 : vector<8x1xf32>
    %42 = math.exp %41 : vector<8x1xf32>
    %43 = arith.mulf %39, %42 : vector<8x1xf32>
    %44 = vector.broadcast %38 : vector<8x1xf32> to vector<8x512xf32>
    %45 = arith.subf %9, %44 : vector<8x512xf32>
    %46 = math.exp %45 : vector<8x512xf32>
    %cst_27 = arith.constant dense<0.000000e+00> : vector<8xf32>
    %47 = vector.multi_reduction <add>, %46, %cst_27 [1] : vector<8x512xf32> to vector<8xf32>
    %48 = vector.shape_cast %47 : vector<8xf32> to vector<8x1xf32>
    %49 = arith.addf %43, %48 : vector<8x1xf32>
    %c0_28 = arith.constant 0 : index
    %c0_29 = arith.constant 0 : index
    %50 = vector.load %arg9[%c0_28, %c0_29] : memref<8x1xf32, #tpu.memory_space<vmem>>, vector<8x1xf32>
    tpu.vector_store %arg9[%c0_28, %c0_29], %49 {strides = array<i32>} : memref<8x1xf32, #tpu.memory_space<vmem>>, vector<8x1xf32>,
    %c0_30 = arith.constant 0 : index
    %c0_31 = arith.constant 0 : index
    %51 = vector.load %arg8[%c0_30, %c0_31] : memref<8x1xf32, #tpu.memory_space<vmem>>, vector<8x1xf32>
    tpu.vector_store %arg8[%c0_30, %c0_31], %38 {strides = array<i32>} : memref<8x1xf32, #tpu.memory_space<vmem>>, vector<8x1xf32>,
    %c1_i32 = arith.constant 1 : i32
    %52 = arith.cmpi eq, %arg1, %c1_i32 : i32
    %53 = arith.extui %52 : i1 to i32
    %c0_i32_32 = arith.constant 0 : i32
    %54 = arith.cmpi ne, %53, %c0_i32_32 : i32
    scf.if %54 {
      %c0_33 = arith.constant 0 : index
      %c0_34 = arith.constant 0 : index
      %55 = vector.load %arg8[%c0_33, %c0_34] : memref<8x1xf32, #tpu.memory_space<vmem>>, vector<8x1xf32>
      %c0_35 = arith.constant 0 : index
      %c0_36 = arith.constant 0 : index
      %56 = vector.load %arg9[%c0_35, %c0_36] : memref<8x1xf32, #tpu.memory_space<vmem>>, vector<8x1xf32>
      %57 = math.log %56 : vector<8x1xf32>
      %58 = arith.addf %55, %57 : vector<8x1xf32>
      %c0_37 = arith.constant 0 : index
      %c0_38 = arith.constant 0 : index
      %59 = vector.load %arg11[%c0_37, %c0_38] : memref<8x1xf32, #tpu.memory_space<vmem>>, vector<8x1xf32>
      %60 = arith.subf %58, %59 : vector<8x1xf32>
      %c0_39 = arith.constant 0 : index
      %c0_40 = arith.constant 0 : index
      %61 = vector.load %arg6[%c0_39, %c0_40] : memref<8x1xf32, #tpu.memory_space<vmem>>, vector<8x1xf32>
      tpu.vector_store %arg6[%c0_39, %c0_40], %60 {strides = array<i32>} : memref<8x1xf32, #tpu.memory_space<vmem>>, vector<8x1xf32>,
      %c0_41 = arith.constant 0 : index
      %c0_42 = arith.constant 0 : index
      %62 = vector.load %arg10[%c0_41, %c0_42] : memref<8x1xi32, #tpu.memory_space<vmem>>, vector<8x1xi32>
      %c0_43 = arith.constant 0 : index
      %c0_44 = arith.constant 0 : index
      %63 = vector.load %arg5[%c0_43, %c0_44] : memref<8x1xi32, #tpu.memory_space<vmem>>, vector<8x1xi32>
      %64 = arith.cmpi eq, %62, %63 : vector<8x1xi32>
      %65 = arith.extui %64 : vector<8x1xi1> to vector<8x1xi32>
      %c0_45 = arith.constant 0 : index
      %c0_46 = arith.constant 0 : index
      %66 = vector.load %arg7[%c0_45, %c0_46] : memref<8x1xi32, #tpu.memory_space<vmem>>, vector<8x1xi32>
      tpu.vector_store %arg7[%c0_45, %c0_46], %65 {strides = array<i32>} : memref<8x1xi32, #tpu.memory_space<vmem>>, vector<8x1xi32>,
    } else {
    }
    return
  }
  func.func @transform_0(%arg0: i32, %arg1: i32) -> (i32, i32) {
    %c0_i32 = arith.constant 0 : i32
    %c0_i32_0 = arith.constant 0 : i32
    return %arg0, %c0_i32 : i32, i32
  }
  func.func @transform_1(%arg0: i32, %arg1: i32) -> (i32, i32) {
    %c0_i32 = arith.constant 0 : i32
    %c0_i32_0 = arith.constant 0 : i32
    return %arg1, %c0_i32 : i32, i32
  }
  func.func @transform_2(%arg0: i32, %arg1: i32) -> (i32, i32) {
    %c0_i32 = arith.constant 0 : i32
    %c0_i32_0 = arith.constant 0 : i32
    %c0_i32_1 = arith.constant 0 : i32
    return %c0_i32, %c0_i32_0 : i32, i32
  }
  func.func @transform_3(%arg0: i32, %arg1: i32) -> (i32, i32) {
    %c0_i32 = arith.constant 0 : i32
    %c0_i32_0 = arith.constant 0 : i32
    return %arg0, %c0_i32 : i32, i32
  }
  func.func @transform_4(%arg0: i32, %arg1: i32) -> (i32, i32) {
    %c0_i32 = arith.constant 0 : i32
    %c0_i32_0 = arith.constant 0 : i32
    return %arg0, %c0_i32 : i32, i32
  }
  func.func @transform_5(%arg0: i32, %arg1: i32) -> (i32, i32) {
    %c0_i32 = arith.constant 0 : i32
    %c0_i32_0 = arith.constant 0 : i32
    return %arg0, %c0_i32 : i32, i32
  }
}

</mosaic_0001>

<bundles_post_ra>
// kernel: mlm_head_loss_and_hits.1
= control target key start
LH: loop header
LB: loop body
LE: loop exit
PB: predicated region body
PF: predicated region fallthrough
CT: control target
= control target key end

     0   :  { %s1206_s18 = smov 0   ;;  %s1208_s19 = smov 0   ;;  %s1388_s0 = inlined_call_operand.vmem [shape: bf16[8,32], index: 0, kind: input, shape index: {}]   ;;  %s1389_s1 = inlined_call_operand.vmem [shape: bf16[1024,32], index: 1, kind: input, shape index: {}]   ;;  %s1390_s2 = inlined_call_operand.vmem [shape: f32[2,512], index: 2, kind: input, shape index: {}]   ;;  %s1391_s3 = inlined_call_operand.vmem [shape: s32[8,1], index: 3, kind: input, shape index: {}]   ;;  %s1392_s4 = inlined_call_operand.vmem [shape: f32[8,1], index: 4, kind: output, shape index: {0}]   ;;  %s1393_s5 = inlined_call_operand.vmem [shape: s32[8,1], index: 5, kind: output, shape index: {1}]  }
   0x1   :  { %s1210_s20 = smov 0  }
   0x2 LB: > { %s25_s21 = sadd.s32 1, %s1165_s19  ;;  %p973_p0 = scmp.ge.s32.totalorder %s1169_s20, 1  ;;  %s1169_s20 = sphi %s1210_s20, %s16_s20   ;;  %s1165_s19 = sphi %s1208_s19, %s1395_s19   ;;  %s1161_s18 = sphi %s1206_s18, %s1394_s18  }
   0x3   : > { %p26_p1 = scmp.ge.s32.totalorder %s25_s21, 2  ;;  %p221_p2 = scmp.lt.s32.totalorder %s1169_s20, 3 }
   0x5   : > { %s1397_s21 = smov (%p26_p1, %s25_s21), 0  ;;  %p222_p3 = pnand %p973_p0, %p221_p2 }
   0x6   : > { %s974_s22 = sshll.u32 (!%p222_p3), %s1161_s18, 6  ;;  %p976_p5 = scmp.ne.s32.totalorder (!%p222_p3), %s1161_s18, 0 }
   0x7   : > { %225 = sbr.rel (%p222_p3) target bundleno = 779 (0x30b), region = 36  ;;  %p265_p4 = scmp.lt.s32.totalorder (!%p222_p3), %s974_s22, 127 }
   0xe   : > { %s1399_s22 = smov (!%p265_p4, %s974_s22), 127  ;;  %286 = sbr.rel (%p976_p5) target bundleno = 21 (0x15), region = 40 }
   0xf   : > { %s975_s23 = sshll.u32 %s1399_s22, 2  ;;  %vm287_vm0 = vcmask (!%p976_p5), 7168   ;;  %v1171_v0 = vmov (!%p976_p5), -inf   ;;  %v1172_v1 = vmov (!%p976_p5), 0.0   ;;  %v1173_v2 = vmov (!%p976_p5), 0  }
  0x10   : > { %s1230_s26 = scalar_lea.vmem %s1389_s1, %s975_s23  ;;  %288 = vst.msk [vmem:[#allocation2] sm:$0xff] (!%p976_p5), %vm287_vm0, %v1171_v0  ;;  %289 = vst.msk [vmem:[#allocation3] sm:$0xff] (!%p976_p5), %vm287_vm0, %v1172_v1 }
  0x11   : > { %291 = vst.msk [vmem:[#allocation5] sm:$0xff] (!%p976_p5), %vm287_vm0, %v1172_v1  ;;  %290 = vst.msk [vmem:[#allocation4] sm:$0xff] (!%p976_p5), %vm287_vm0, %v1173_v2 }
  0x15 PF: > { %v1103_v3 = vld [vmem:[%s1230_s26 + $0x40] sm:$0xff]   ;;  %vm547_vm1 = vcmask 261120   ;;  %v1107_v8 = vld [vmem:[%s1230_s26 + $0x48] sm:$0xff]   ;;  %v1111_v14 = vld [vmem:[%s1230_s26 + $0x50] sm:$0xff]   ;;  %s357_s29 = sshra.s32 %s1161_s18, 1  ;;  %s360_s30 = sand.u32 1, %s1161_s18  ;;  %v367_v52 = vlaneseq }
  0x16   : > { %v1104_v4 = vld [vmem:[%s1230_s26 + $0xc0] sm:$0xff]   ;;  %1056 = vmatprep.subr.msk.bf16.mxu0 %vm547_vm1, %v1103_v3  ;;  %v1108_v10 = vld [vmem:[%s1230_s26 + $0xc8] sm:$0xff]   ;;  %v1112_v16 = vld [vmem:[%s1230_s26 + $0xd0] sm:$0xff]   ;;  %s1019_s6 = sshll.u32 %s357_s29, 3  ;;  %s1013_s11 = sshll.u32 %s1161_s18, 9  ;;  %vm759_vm2 = vcmask 7168  }
  0x17   : > { %v1105_v5 = vld [vmem:[%s1230_s26] sm:$0xff]   ;;  %1064 = vmatprep.subr.msk.bf16.mxu1 %vm547_vm1, %v1104_v4  ;;  %v1109_v11 = vld [vmem:[%s1230_s26 + $0x8] sm:$0xff]   ;;  %v1113_v17 = vld [vmem:[%s1230_s26 + $0x10] sm:$0xff]   ;;  %s363_s7 = sadd.s32 %s1019_s6, %s360_s30  ;;  %v368_v53 = vshrl.u32 %v367_v52, 7  ;;  %p1014_p6 = scmp.ne.s32.totalorder %s1161_s18, 1 }
  0x18   : > { %v1106_v6 = vld [vmem:[%s1230_s26 + $0x80] sm:$0xff]   ;;  %v552_v7 = vsel %vm547_vm1, %v1105_v5, 0  ;;  %v1110_v12 = vld [vmem:[%s1230_s26 + $0x88] sm:$0xff]   ;;  %v555_v13 = vsel %vm547_vm1, %v1109_v11, 0  ;;  %v1114_v18 = vld [vmem:[%s1230_s26 + $0x90] sm:$0xff]   ;;  %v558_v19 = vsel %vm547_vm1, %v1113_v17, 0  ;;  %s364_s10 = scalar_lea.vmem %s1390_s2, %s363_s7 }
  0x19   : > { %1021 = vmatpush3.bf16.xpose.msra.mxu0 %v552_v7  ;;  %v600_v9 = vsel %vm547_vm1, %v1106_v6, 0  ;;  %v603_v15 = vsel %vm547_vm1, %v1110_v12, 0  ;;  %v1115_v20 = vld [vmem:[%s1230_s26 + $0x58] sm:$0xff]   ;;  %v606_v21 = vsel %vm547_vm1, %v1114_v18, 0  ;;  %v1119_v26 = vld [vmem:[%s1230_s26 + $0x60] sm:$0xff]   ;;  %v1123_v33 = vld [vmem:[%s1230_s26 + $0x68] sm:$0xff]  }
  0x1a   : > { %1039 = vmatpush3.bf16.xpose.msra.mxu1 %v600_v9  ;;  %1057 = vmatprep.subr.msk.bf16.mxu0 %vm547_vm1, %v1107_v8  ;;  %v1116_v22 = vld [vmem:[%s1230_s26 + $0xd8] sm:$0xff]   ;;  %v1120_v28 = vld [vmem:[%s1230_s26 + $0xe0] sm:$0xff]   ;;  %v1124_v35 = vld [vmem:[%s1230_s26 + $0xe8] sm:$0xff]   ;;  %v369_v54 = vsub.s32 0, %v368_v53  ;;  %v377_v56 = vsub.s32 2, %v368_v53  ;;  %v373_v57 = vsub.s32 1, %v368_v53 }
  0x1b   : > { %1065 = vmatprep.subr.msk.bf16.mxu1 %vm547_vm1, %v1108_v10  ;;  %v1117_v23 = vld [vmem:[%s1230_s26 + $0x18] sm:$0xff]   ;;  %v1121_v29 = vld [vmem:[%s1230_s26 + $0x20] sm:$0xff]   ;;  %v1125_v36 = vld [vmem:[%s1230_s26 + $0x28] sm:$0xff]   ;;  %v381_v58 = vsub.s32 3, %v368_v53 }
  0x1c   : > { %v1118_v24 = vld [vmem:[%s1230_s26 + $0x98] sm:$0xff]   ;;  %v561_v25 = vsel %vm547_vm1, %v1117_v23, 0  ;;  %v1122_v30 = vld [vmem:[%s1230_s26 + $0xa0] sm:$0xff]   ;;  %v564_v32 = vsel %vm547_vm1, %v1121_v29, 0  ;;  %v1126_v37 = vld [vmem:[%s1230_s26 + $0xa8] sm:$0xff]   ;;  %v567_v38 = vsel %vm547_vm1, %v1125_v36, 0 }
  0x1d   : > { %v609_v27 = vsel %vm547_vm1, %v1118_v24, 0  ;;  %v292_v31 = vld [vmem:[%s1388_s0] sm:$0xf]  ;;  %v612_v34 = vsel %vm547_vm1, %v1122_v30, 0  ;;  %v1127_v39 = vld [vmem:[%s1230_s26 + $0x70] sm:$0xff]   ;;  %v615_v40 = vsel %vm547_vm1, %v1126_v37, 0 }
  0x1e   : > { %1036 = vmatprep.mubr.msk.bf16.mxu0 %vm547_vm1, %v292_v31  ;;  %1054 = vmatprep.mubr.msk.bf16.mxu1 %vm547_vm1, %v292_v31  ;;  %v1128_v41 = vld [vmem:[%s1230_s26 + $0xf0] sm:$0xff]   ;;  %v1131_v45 = vld [vmem:[%s1230_s26 + $0x78] sm:$0xff]   ;;  %v365_v55 = vld [vmem:[%s364_s10] ss:$2 sm:$0xf] }
  0x1f   : > { %v1129_v42 = vld [vmem:[%s1230_s26 + $0x30] sm:$0xff]   ;;  %v1132_v47 = vld [vmem:[%s1230_s26 + $0xf8] sm:$0xff]   ;;  %v370_v59 = vrot.slane %v365_v55, %v369_v54  ;;  %v378_v60 = vrot.slane %v365_v55, %v377_v56  ;;  %v374_v61 = vrot.slane %v365_v55, %v373_v57  ;;  %v382_v62 = vrot.slane %v365_v55, %v381_v58  ;;  %v740_v37 = vld [vmem:[%s1391_s3] sm:$0xff] }
  0x20   : > { %v1130_v43 = vld [vmem:[%s1230_s26 + $0xb0] sm:$0xff]   ;;  %v570_v44 = vsel %vm547_vm1, %v1129_v42, 0  ;;  %v1133_v48 = vld [vmem:[%s1230_s26 + $0x38] sm:$0xff]  }
  0x21   : > { %1023 = vmatpush3.bf16.xpose.msra.mxu0 %v555_v13  ;;  %v618_v46 = vsel %vm547_vm1, %v1130_v43, 0  ;;  %v1134_v49 = vld [vmem:[%s1230_s26 + $0xb8] sm:$0xff]   ;;  %v573_v50 = vsel %vm547_vm1, %v1133_v48, 0 }
  0x22   : > { %1041 = vmatpush3.bf16.xpose.msra.mxu1 %v603_v15  ;;  %1058 = vmatprep.subr.msk.bf16.mxu0 %vm547_vm1, %v1111_v14  ;;  %v621_v51 = vsel %vm547_vm1, %v1134_v49, 0  ;;  %v1174_v14 = vmov 0   ;;  %v730_v15 = vand.u32 127, %v367_v52 }
  0x23   : > { %1066 = vmatprep.subr.msk.bf16.mxu1 %vm547_vm1, %v1112_v16  ;;  %1101 = vset.pattern.permute.xlu0 %v1174_v14 }
  0x24   : > { %1102 = vset.pattern.permute.xlu1 %v1174_v14  ;;  %v731_v16 = vadd.s32 128, %v730_v15  ;;  %v732_v17 = vadd.s32 256, %v730_v15  ;;  %v733_v18 = vadd.s32 384, %v730_v15 }
  0x29   : > { %1025 = vmatpush3.bf16.xpose.msra.mxu0 %v558_v19  ;;  %v735_v19 = vstv %s1013_s11 }
  0x2a   : > { %1043 = vmatpush3.bf16.xpose.msra.mxu1 %v606_v21  ;;  %1059 = vmatprep.subr.msk.bf16.mxu0 %vm547_vm1, %v1115_v20  ;;  %v1322_v20 = vld [vmem:[#allocation2] sm:$0xff]  ;;  %v736_v21 = vadd.s32 %v735_v19, %v730_v15  ;;  %v1324_v23 = vadd.s32 %v735_v19, %v732_v17  ;;  %v1326_v24 = vadd.s32 %v735_v19, %v733_v18 }
  0x2b   : > { %1067 = vmatprep.subr.msk.bf16.mxu1 %vm547_vm1, %v1116_v22  ;;  %v737_v22 = vadd.s32 %v735_v19, %v731_v16 }
  0x31   : > { %1027 = vmatpush3.bf16.xpose.msra.mxu0 %v561_v25 }
  0x32   : > { %1045 = vmatpush3.bf16.xpose.msra.mxu1 %v609_v27  ;;  %1060 = vmatprep.subr.msk.bf16.mxu0 %vm547_vm1, %v1119_v26 }
  0x33   : > { %1068 = vmatprep.subr.msk.bf16.mxu1 %vm547_vm1, %v1120_v28 }
  0x39   : > { %1029 = vmatpush3.bf16.xpose.msra.mxu0 %v564_v32 }
  0x3a   : > { %1047 = vmatpush3.bf16.xpose.msra.mxu1 %v612_v34  ;;  %1061 = vmatprep.subr.msk.bf16.mxu0 %vm547_vm1, %v1123_v33 }
  0x3b   : > { %1069 = vmatprep.subr.msk.bf16.mxu1 %vm547_vm1, %v1124_v35 }
  0x41   : > { %1031 = vmatpush3.bf16.xpose.msra.mxu0 %v567_v38 }
  0x42   : > { %1049 = vmatpush3.bf16.xpose.msra.mxu1 %v615_v40  ;;  %1062 = vmatprep.subr.msk.bf16.mxu0 %vm547_vm1, %v1127_v39 }
  0x43   : > { %1070 = vmatprep.subr.msk.bf16.mxu1 %vm547_vm1, %v1128_v41 }
  0x49   : > { %1033 = vmatpush3.bf16.xpose.msra.mxu0 %v570_v44 }
  0x4a   : > { %1051 = vmatpush3.bf16.xpose.msra.mxu1 %v618_v46  ;;  %1063 = vmatprep.subr.msk.bf16.mxu0 %vm547_vm1, %v1131_v45 }
  0x4b   : > { %1071 = vmatprep.subr.msk.bf16.mxu1 %vm547_vm1, %v1132_v47 }
  0x51   : > { %1035 = vmatpush3.bf16.xpose.msra.mxu0 %v573_v50 }
  0x52   : > { %1053 = vmatpush3.bf16.xpose.msra.mxu1 %v621_v51 }
  0x58   : > { %1037 = vmatmul.mubr.msk.bf16.vlgmr.msra.gmra.mrb[0].mxu0 %vm547_vm1, %v292_v31 }
  0x59   : > { %1055 = vmatmul.mubr.msk.bf16.vlgmr.msra.gmra.mrb[0].mxu1 %vm547_vm1, %v292_v31 }
 0x12b   : > { %v681_v63 = vpop.f32.mrb[0].mxu0 }
 0x12c   : > { %v1309_v0 = vadd.f32 %v681_v63, %v370_v59  ;;  %v722_v1 = vpop.f32.mrb[0].mxu1  ;;  %v683_v2 = vpop.f32.mrb[1].mxu0 }
 0x12d   : > { %v1311_v3 = vadd.f32 %v722_v1, %v378_v60  ;;  %v1313_v4 = vadd.f32 %v683_v2, %v374_v61  ;;  %v724_v5 = vpop.f32.mrb[1].mxu1  ;;  %v685_v6 = vpop.f32.mrb[2].mxu0 }
 0x12e   : > { %v1315_v7 = vadd.f32 %v724_v5, %v382_v62  ;;  %v726_v8 = vpop.f32.mrb[2].mxu1  ;;  %v686_v9 = vpop.f32.mrb[3].mxu0 }
 0x12f   : > { %v727_v10 = vpop.f32.mrb[3].mxu1  ;;  %v761_v11 = vmax.f32 %v1309_v0, %v1313_v4 }
 0x130   : > { %v762_v12 = vmax.f32 %v1311_v3, %v1315_v7  ;;  %v801_v10 = vld [vmem:[#allocation3] sm:$0xff] }
 0x132   : > { %v763_v13 = vmax.f32 %v761_v11, %v762_v12 }
 0x134   : > { %764 = vmax.xlane.f32.xlu0 %v763_v13 }
 0x1c1   : > { %v1328_v25 = vpop.xlane.xlu0 %764 }
 0x1c2   : > { %v1332_v26 = vmax.f32 %v1322_v20, %v1328_v25  ;;  %vm766_vm3 = vcmp.eq.f32.partialorder %v1309_v0, %v1328_v25  ;;  %vm767_vm4 = vcmp.eq.f32.partialorder %v1313_v4, %v1328_v25  ;;  %vm768_vm5 = vcmp.eq.f32.partialorder %v1311_v3, %v1328_v25 }
 0x1c3   : > { %vm769_vm6 = vcmp.eq.f32.partialorder %v1315_v7, %v1328_v25  ;;  %v770_v27 = vsel %vm766_vm3, %v736_v21, 2147483647  ;;  %v771_v28 = vsel %vm767_vm4, %v737_v22, 2147483647  ;;  %v772_v29 = vsel %vm768_vm5, %v1324_v23, 2147483647 }
 0x1c4   : > { %808 = vperm.xlu0 %1101, %v1332_v26   ;;  %v802_v30 = vsub.f32 %v1322_v20, %v1332_v26  ;;  %v773_v31 = vsel %vm769_vm6, %v1326_v24, 2147483647  ;;  %vm774_vm7 = vcmp.lt.s32.totalorder %v770_v27, %v771_v28  ;;  %830 = vst.msk [vmem:[#allocation2] sm:$0xff] %vm759_vm2, %v1332_v26  ;;  %vm795_vm15 = vcmp.gt.f32.partialorder %v1328_v25, %v1322_v20  ;;  %v844_v20 = vld [vmem:[%s1391_s3] sm:$0xff] (!%p1014_p6) }
 0x1c5   : > { %v775_v32 = vsel %vm774_vm7, %v770_v27, %v771_v28  ;;  %vm776_vm8 = vcmp.lt.s32.totalorder %v772_v29, %v773_v31 }
 0x1c6   : > { %v777_v33 = vsel %vm776_vm8, %v772_v29, %v773_v31  ;;  %v803_v5 = vmul.f32 1.442695, %v802_v30 }
 0x1c7   : > { %vm778_vm9 = vcmp.lt.s32.totalorder %v775_v32, %v777_v33 }
 0x1c8   : > { %v779_v34 = vsel %vm778_vm9, %v775_v32, %v777_v33 }
 0x1c9   : > { %v781_v35 = vshra.s32 %v779_v34, 16  ;;  %v780_v49 = vand.u32 65535, %v779_v34 }
 0x1cb   : > { %v783_v36 = vcvt.s32.f32 %v781_v35  ;;  %v782_v53 = vcvt.s32.f32 %v780_v49 }
 0x1cd   : > { %784 = vmin.xlane.f32.xlu1 %v783_v36 }
 0x1de   : > { %743 = vperm.xlu1 %1102, %v740_v37  }
 0x243   : > { %v809_v38 = vpop.permute.xlu0 %808 }
 0x244   : > { %v811_v39 = vsub.f32 %v1309_v0, %v809_v38  ;;  %v812_v40 = vsub.f32 %v1313_v4, %v809_v38  ;;  %v813_v43 = vsub.f32 %v1311_v3, %v809_v38  ;;  %v814_v44 = vsub.f32 %v1315_v7, %v809_v38 }
 0x246   : > { %v815_v41 = vmul.f32 1.442695, %v811_v39  ;;  %v817_v42 = vmul.f32 1.442695, %v812_v40  ;;  %v819_v45 = vmul.f32 1.442695, %v813_v43 }
 0x247   : > { %v821_v46 = vmul.f32 1.442695, %v814_v44 }
 0x248   : > { %1135 = vpow2.f32 %v815_v41 }
 0x249   : > { %1137 = vpow2.f32 %v817_v42 }
 0x24a   : > { %1139 = vpow2.f32 %v819_v45 }
 0x24b   : > { %1141 = vpow2.f32 %v821_v46 }
 0x24c   : > { %1143 = vpow2.f32 %v803_v5 }
 0x252   : > { %v1136_v47 = vpop.eup %1135 }
 0x253   : > { %v1138_v48 = vpop.eup %1137 }
 0x254   : > { %v823_v50 = vadd.f32 %v1138_v48, %v1136_v47  ;;  %v1140_v51 = vpop.eup %1139 }
 0x255   : > { %v1142_v56 = vpop.eup %1141 }
 0x256   : > { %v824_v54 = vadd.f32 %v1140_v51, %v823_v50  ;;  %v1144_v8 = vpop.eup %1143 }
 0x257   : > { %v805_v13 = vmul.f32 %v1144_v8, %v801_v10 }
 0x258   : > { %v825_v58 = vadd.f32 %v1142_v56, %v824_v54 }
 0x25a   : > { %v785_v52 = vpop.xlane.xlu1 %784 }
 0x25b   : > { %vm786_vm10 = vcmp.eq.f32.partialorder %v783_v36, %v785_v52  ;;  %v791_v6 = vcvt.f32.s32 %v785_v52 }
 0x25c   : > { %v787_v55 = vsel %vm786_vm10, %v782_v53, inf }
 0x25d   : > { %788 = vmin.xlane.f32.xlu1 %v787_v55 }
 0x25e   : > { %v744_v57 = vpop.permute.xlu1 %743 }
 0x25f   : > { %vm745_vm11 = vcmp.eq.s32.totalorder %v736_v21, %v744_v57  ;;  %vm746_vm12 = vcmp.eq.s32.totalorder %v737_v22, %v744_v57  ;;  %vm747_vm13 = vcmp.eq.s32.totalorder %v1324_v23, %v744_v57  ;;  %vm748_vm14 = vcmp.eq.s32.totalorder %v1326_v24, %v744_v57  ;;  %v835_v24 = vld [vmem:[#allocation2] sm:$0xff] (!%p1014_p6) }
 0x260   : > { %v749_v59 = vsel %vm745_vm11, %v1309_v0, 0.0  ;;  %v750_v60 = vsel %vm746_vm12, %v1313_v4, 0.0  ;;  %v751_v62 = vsel %vm747_vm13, %v1311_v3, 0.0  ;;  %v752_v1 = vsel %vm748_vm14, %v1315_v7, 0.0  ;;  %v796_v4 = vld [vmem:[#allocation4] sm:$0xff]  ;;  %v741_v7 = vld [vmem:[#allocation5] sm:$0xff] }
 0x261   : > { %826 = vadd.xlane.f32.xlu1 %v825_v58  ;;  %v753_v61 = vadd.f32 %v750_v60, %v749_v59  ;;  %v792_v0 = vshll.u32 %v791_v6, 16  ;;  %v1175_v21 = vmov (!%p1014_p6), 0  }
 0x263   : > { %v754_v63 = vadd.f32 %v753_v61, %v751_v62 }
 0x265   : > { %v755_v2 = vadd.f32 %v754_v63, %v752_v1 }
 0x267   : > { %756 = vadd.xlane.f32.xlu0 %v755_v2 }
 0x2ea   : > { %v789_v9 = vpop.xlane.xlu1 %788 }
 0x2eb   : > { %v790_v11 = vcvt.f32.s32 %v789_v9 }
 0x2ed   : > { %v793_v12 = vadd.s32 %v792_v0, %v790_v11 }
 0x2ee   : > { %v827_v3 = vpop.xlane.xlu1 %826 }
 0x2ef   : > { %v797_v14 = vsel %vm795_vm15, %v793_v12, %v796_v4  ;;  %v828_v15 = vadd.f32 %v827_v3, %v805_v13 }
 0x2f0   : > { %798 = vst.msk [vmem:[#allocation4] sm:$0xff] %vm759_vm2, %v797_v14 }
 0x2f1   : > { %829 = vst.msk [vmem:[#allocation3] sm:$0xff] %vm759_vm2, %v828_v15  ;;  %834 = sbr.rel (%p1014_p6) target bundleno = 779 (0x30b), region = 44 }
 0x2f4   : > { %v757_v16 = vpop.xlane.xlu0 %756 }
 0x2f5   : > { %v758_v17 = vadd.f32 %v757_v16, %v741_v7 }
 0x2f7   : > { %760 = vst.msk [vmem:[#allocation5] sm:$0xff] %vm759_vm2, %v758_v17  ;;  %v843_v19 = vld [vmem:[#allocation4] sm:$0xff] (!%p1014_p6) }
 0x2f8   : > { %v836_v18 = vld [vmem:[#allocation3] sm:$0xff]  ;;  %vm845_vm0 = vcmp.eq.s32.totalorder %v843_v19, %v844_v20 }
 0x2f9   : > { %1145 = vlog2.f32 %v836_v18  ;;  %v846_v22 = vsel %vm845_vm0, 1, %v1175_v21 }
 0x2fa   : > { %847 = vst.msk [vmem:[%s1393_s5] sm:$0xff] %vm759_vm2, %v846_v22 }
 0x2fe   : > { %v840_v26 = vld [vmem:[#allocation5] sm:$0xff] }
 0x303   : > { %v1146_v23 = vpop.eup %1145 }
 0x304   : > { %v838_v25 = vmul.f32 0.6931472, %v1146_v23 }
 0x306   : > { %v839_v27 = vadd.f32 %v838_v25, %v835_v24 }
 0x308   : > { %v841_v28 = vsub.f32 %v839_v27, %v840_v26 }
 0x30a   : > { %842 = vst.msk [vmem:[%s1392_s4] sm:$0xff] %vm759_vm2, %v841_v28 }
 0x30b PF: > { %s16_s20 = sadd.s32 1, %s1169_s20   ;;  %s1394_s18 = smov %s1165_s19 }
 0x30c   : > { %p13_p7 = scmp.ge.s32.totalorder %s16_s20, 4   ;;  %s1395_s19 = smov %s1397_s21 }
 0x30e   :  { %15 = sbr.rel (!%p13_p7) target bundleno = 2 (0x2), region = 93 }

</bundles_post_ra>
